<compile_context>
chip_gen: v5e
topology: v5e:2x2
jax: 0.10.0
libtpu: 0.0.40
codegen_flags: <defaults>
</compile_context>

<pallas_src>
import math

import jax
import jax.numpy as jnp
from jax import lax
from jax.experimental import pallas as pl
from jax.experimental.pallas import tpu as pltpu

EPS = 1e-5


def _make_resblock_kernel(N, H, W, Cin, Cout, mm_dtype):
    NH = N * H
    NHW = N * H * W
    WC = W * Cout
    inv_count = 1.0 / float(NHW)

    def kernel(x_ref, wc1_ref, wc2_ref, g1s_ref, b1s_ref, g2_ref, b2_ref,
               s_ref, out_ref):
        # row-validity masks for the dh = -1 / +1 taps (shared by both convs)
        r = lax.broadcasted_iota(jnp.int32, (NH, 1), 0)
        h_idx = r % H
        valid_up = h_idx > 0          # (n, h-1) stays inside the image
        valid_dn = h_idx < H - 1      # (n, h+1) stays inside the image

        def make_col(a):
            # dh taps via XLU sublane rotation + row mask; the dw taps and the
            # W zero-padding are baked into the block weights.  Each tap is
            # cast to the MXU dtype *before* the lane concat.
            t_up = jnp.where(valid_up, pltpu.roll(a, shift=1, axis=0), 0.0)
            t_dn = jnp.where(valid_dn, pltpu.roll(a, shift=NH - 1, axis=0), 0.0)
            return jnp.concatenate(
                [t_up.astype(mm_dtype), a.astype(mm_dtype), t_dn.astype(mm_dtype)],
                axis=1)

        def bn_scale_bias(y, g, b, s_mat):
            # one-pass stats: sum & sumsq; one tiny matmul both reduces over
            # the w lane groups per channel and broadcasts back to all lanes.
            stats = jnp.concatenate(
                [jnp.sum(y, axis=0, keepdims=True),
                 jnp.sum(y * y, axis=0, keepdims=True)], axis=0)          # (2, K)
            stats = jnp.dot(stats, s_mat, preferred_element_type=jnp.float32)
            mean = stats[0:1] * inv_count
            var = stats[1:2] * inv_count - mean * mean                    # biased, train-mode
            scale = g * lax.rsqrt(var + EPS)
            bias = b - mean * scale
            return scale, bias

        x = x_ref[...]                                                    # (NH, W*Cin) f32
        s_mat = s_ref[...]                                                # (2*WC, 2*WC) f32

        # conv1 (3x3) + fused shortcut 1x1  ->  one MXU pass, (NH, 2*WC) f32
        y1 = jnp.dot(make_col(x), wc1_ref[...], preferred_element_type=jnp.float32)
        sc1, bi1 = bn_scale_bias(y1, g1s_ref[...], b1s_ref[...], s_mat)
        z1 = y1 * sc1 + bi1
        h1 = jnp.maximum(z1[:, :WC], 0.0)      # left branch: BN1 + ReLU
        short = z1[:, WC:]                     # shortcut branch: BNsc (no ReLU)

        # conv2 (3x3) -> BN2
        y2 = jnp.dot(make_col(h1), wc2_ref[...], preferred_element_type=jnp.float32)
        sc2, bi2 = bn_scale_bias(y2, g2_ref[...], b2_ref[...], s_mat[:WC, :WC])

        out_ref[...] = jnp.maximum(y2 * sc2 + bi2 + short, 0.0).astype(out_ref.dtype)

    return kernel


def _conv_block_weight(w_hwio, W):
    """(3,3,Ci,Co) HWIO -> (3*W*Ci, W*Co) lane-dense block weight.

    Row index k = dh_i*(W*Ci) + w*Ci + ci, col index m = w'*Co + co; the dw
    shift and the zero padding along W are folded into the sparsity pattern."""
    _, _, Ci, Co = w_hwio.shape
    dw = jnp.arange(3) - 1
    ind = (jnp.arange(W)[None, :, None] - dw[:, None, None]
           == jnp.arange(W)[None, None, :]).astype(w_hwio.dtype)          # (3, w, w')
    big = jnp.einsum('dxio,xwp->dwipo', w_hwio, ind)                      # (3,W,Ci,W,Co)
    return big.reshape(3 * W * Ci, W * Co)


def _shortcut_block_weight(wsc_2d, W):
    """(Ci,Co) 1x1 conv -> (3*W*Ci, W*Co): identity over w, only in the dh=0 block."""
    Ci, Co = wsc_2d.shape
    eye = jnp.eye(W, dtype=wsc_2d.dtype)
    blk = jnp.einsum('io,wp->wipo', wsc_2d, eye).reshape(W * Ci, W * Co)
    z = jnp.zeros((W * Ci, W * Co), wsc_2d.dtype)
    return jnp.concatenate([z, blk, z], axis=0)


def residual_block_pallas(x_nchw, params, use_bf16=True):
    """x_nchw: (N, Cin, H, W) float32.  Returns (N, Cout, H, W) float32."""
    N, Cin, H, W = x_nchw.shape
    Cout = params["w1"].shape[-1]
    NH, NHW, WC = N * H, N * H * W, W * Cout
    mm_dtype = jnp.bfloat16 if use_bf16 else jnp.float32

    # lane-dense input: rows = (n,h), lanes = (w, ci)
    x2d = jnp.transpose(x_nchw, (0, 2, 3, 1)).reshape(NH, W * Cin)

    # block weights (dw shift + W padding folded in); shortcut fused into conv1
    wc1 = jnp.concatenate(
        [_conv_block_weight(params["w1"], W),
         _shortcut_block_weight(params["wsc"].reshape(Cin, Cout), W)],
        axis=1).astype(mm_dtype)                                          # (3*W*Cin, 2*WC)
    wc2 = _conv_block_weight(params["w2"], W).astype(mm_dtype)            # (3*WC, WC)

    # BN affine params tiled across the w lane groups; conv1 & shortcut concatenated
    tile = lambda p: jnp.tile(p.reshape(1, Cout).astype(jnp.float32), (1, W))
    g1s = jnp.concatenate([tile(params["g1"]), tile(params["gsc"])], axis=1)
    b1s = jnp.concatenate([tile(params["b1"]), tile(params["bsc"])], axis=1)
    g2, b2 = tile(params["g2"]), tile(params["b2"])

    # channel-grouping matrix: per-channel reduce + broadcast across w in one matmul
    idx = jnp.arange(2 * WC)
    chan = (idx // WC) * Cout + (idx % Cout)
    s_mat = (chan[:, None] == chan[None, :]).astype(jnp.float32)          # (2*WC, 2*WC)

    flops = (2 * NH * (3 * W * Cin) * (2 * WC) + 2 * NH * (3 * WC) * WC
             + 2 * 2 * (2 * WC) * (2 * WC) + 10 * NH * WC)
    bytes_accessed = (4 * (NH * W * Cin + NH * WC + (2 * WC) ** 2)
                      + 2 * (3 * W * Cin * 2 * WC + 3 * WC * WC))
    vmem = pl.BlockSpec(memory_space=pltpu.MemorySpace.VMEM)

    out2d = pl.pallas_call(
        _make_resblock_kernel(N, H, W, Cin, Cout, mm_dtype),
        out_shape=jax.ShapeDtypeStruct((NH, WC), jnp.float32),
        in_specs=[vmem] * 8,
        out_specs=vmem,
        compiler_params=pltpu.CompilerParams(vmem_limit_bytes=64 * 1024 * 1024),
        cost_estimate=pl.CostEstimate(flops=int(flops), transcendentals=3 * WC,
                                      bytes_accessed=int(bytes_accessed)),
    )(x2d, wc1, wc2, g1s, b1s, g2, b2, s_mat)

    # (N*H, W*Cout) lane-dense -> NHWC -> NCHW
    return jnp.transpose(out2d.reshape(N, H, W, Cout), (0, 3, 1, 2))


def residual_block_ref(x_nchw, params):
    """Pure-JAX reference matching the PyTorch semantics (train-mode BN)."""
    x = jnp.transpose(x_nchw, (0, 2, 3, 1))

    def conv(x, w_hwio, pad):
        return lax.conv_general_dilated(
            x, w_hwio, window_strides=(1, 1), padding=((pad, pad), (pad, pad)),
            dimension_numbers=("NHWC", "HWIO", "NHWC"))

    def batchnorm(y, g, b):
        m = jnp.mean(y, axis=(0, 1, 2), keepdims=True)
        v = jnp.mean((y - m) ** 2, axis=(0, 1, 2), keepdims=True)
        return (y - m) * lax.rsqrt(v + EPS) * g + b

    h = conv(x, params["w1"], 1)
    h = jnp.maximum(batchnorm(h, params["g1"], params["b1"]), 0.0)
    h = conv(h, params["w2"], 1)
    h = batchnorm(h, params["g2"], params["b2"])
    s = conv(x, params["wsc"], 0)
    s = batchnorm(s, params["gsc"], params["bsc"])
    out = jnp.maximum(h + s, 0.0)
    return jnp.transpose(out, (0, 3, 1, 2))


if __name__ == "__main__":
    N, Cin, Cout, H, W = 2, 4, 8, 16, 16

    key = jax.random.PRNGKey(0)
    kx, k1, k2, k3 = jax.random.split(key, 4)

    params = {
        # conv weights in HWIO layout (== PyTorch OIHW transposed), bias=False
        "w1": jax.random.normal(k1, (3, 3, Cin, Cout), jnp.float32)
              * (1.0 / math.sqrt(9 * Cin)),
        "w2": jax.random.normal(k2, (3, 3, Cout, Cout), jnp.float32)
              * (1.0 / math.sqrt(9 * Cout)),
        "wsc": jax.random.normal(k3, (1, 1, Cin, Cout), jnp.float32)
               * (1.0 / math.sqrt(Cin)),
        # BatchNorm affine params at PyTorch defaults
        "g1": jnp.ones((Cout,), jnp.float32), "b1": jnp.zeros((Cout,), jnp.float32),
        "g2": jnp.ones((Cout,), jnp.float32), "b2": jnp.zeros((Cout,), jnp.float32),
        "gsc": jnp.ones((Cout,), jnp.float32), "bsc": jnp.zeros((Cout,), jnp.float32),
    }

    x = jax.random.normal(kx, (N, Cin, H, W), jnp.float32)  # NCHW, like PyTorch

    ref = jax.block_until_ready(residual_block_ref(x, params))

    # exactness check: f32 MXU operands must match the reference tightly
    out_f32 = jax.block_until_ready(residual_block_pallas(x, params, use_bf16=False))
    assert out_f32.shape == (N, Cout, H, W), out_f32.shape
    assert jnp.allclose(out_f32, ref, atol=1e-3, rtol=1e-3), (
        float(jnp.max(jnp.abs(out_f32 - ref))))

    # perf path: bf16 MXU operands, f32 accumulation -> slightly looser tol
    out_bf16 = jax.block_until_ready(residual_block_pallas(x, params, use_bf16=True))
    assert jnp.allclose(out_bf16, ref, atol=3e-2, rtol=3e-2), (
        float(jnp.max(jnp.abs(out_bf16 - ref))))

    print("KERNEL_OK")
</pallas_src>

<mosaic_0001>
module attributes {stable_mosaic.version = 11 : i64} {
  func.func @kernel(%arg0: memref<32x64xf32, #tpu.memory_space<vmem>>, %arg1: memref<192x256xf32, #tpu.memory_space<vmem>>, %arg2: memref<384x128xf32, #tpu.memory_space<vmem>>, %arg3: memref<1x256xf32, #tpu.memory_space<vmem>>, %arg4: memref<1x256xf32, #tpu.memory_space<vmem>>, %arg5: memref<1x128xf32, #tpu.memory_space<vmem>>, %arg6: memref<1x128xf32, #tpu.memory_space<vmem>>, %arg7: memref<256x256xf32, #tpu.memory_space<vmem>>, %arg8: memref<32x128xf32, #tpu.memory_space<vmem>>) attributes {dimension_semantics = [], scalar_prefetch = 0 : i64, scratch_operands = 0 : i64, tpu.core_type = #tpu.core_type<tc>} {
    %0 = tpu.iota {dimensions = array<i32: 0>} : vector<32x1xi32>
    %c16_i32 = arith.constant 16 : i32
    %c0_i32 = arith.constant 0 : i32
    %1 = arith.cmpi eq, %c16_i32, %c0_i32 : i32
    %c1_i32 = arith.constant 1 : i32
    %2 = arith.select %1, %c1_i32, %c16_i32 : i32
    %3 = vector.broadcast %2 : i32 to vector<32x1xi32>
    %4 = arith.remsi %0, %3 : vector<32x1xi32>
    %c0_i32_0 = arith.constant 0 : i32
    %5 = vector.broadcast %c0_i32_0 : i32 to vector<32x1xi32>
    %6 = arith.cmpi ne, %4, %5 : vector<32x1xi32>
    %c0_i32_1 = arith.constant 0 : i32
    %7 = vector.broadcast %c0_i32_1 : i32 to vector<32x1xi32>
    %8 = arith.cmpi slt, %4, %7 : vector<32x1xi32>
    %c0_i32_2 = arith.constant 0 : i32
    %9 = arith.cmpi slt, %2, %c0_i32_2 : i32
    %10 = vector.broadcast %9 : i1 to vector<32x1xi1>
    %11 = vector.broadcast %10 : vector<32x1xi1> to vector<32x1xi1>
    %12 = arith.xori %8, %11 : vector<32x1xi1>
    %13 = arith.andi %12, %6 : vector<32x1xi1>
    %14 = vector.broadcast %2 : i32 to vector<32x1xi32>
    %15 = arith.addi %4, %14 : vector<32x1xi32>
    %16 = arith.select %13, %15, %4 : vector<32x1xi1>, vector<32x1xi32>
    %c0_i32_3 = arith.constant 0 : i32
    %17 = vector.broadcast %c0_i32_3 : i32 to vector<32x1xi32>
    %18 = arith.cmpi sgt, %16, %17 : vector<32x1xi32>
    %c15_i32 = arith.constant 15 : i32
    %19 = vector.broadcast %c15_i32 : i32 to vector<32x1xi32>
    %20 = arith.cmpi slt, %16, %19 : vector<32x1xi32>
    %c0 = arith.constant 0 : index
    %c0_4 = arith.constant 0 : index
    %21 = vector.load %arg0[%c0, %c0_4] : memref<32x64xf32, #tpu.memory_space<vmem>>, vector<32x64xf32>
    %c0_5 = arith.constant 0 : index
    %c0_6 = arith.constant 0 : index
    %22 = vector.load %arg7[%c0_5, %c0_6] : memref<256x256xf32, #tpu.memory_space<vmem>>, vector<256x256xf32>
    %c1_i32_7 = arith.constant 1 : i32
    %23 = tpu.dynamic_rotate %21 by %c1_i32_7 dim 0 : vector<32x64xf32>, i32 -> vector<32x64xf32>
    %cst = arith.constant 0.000000e+00 : f32
    %24 = vector.shape_cast %18 : vector<32x1xi1> to vector<32x1xi1>
    %25 = vector.broadcast %24 : vector<32x1xi1> to vector<32x64xi1>
    %26 = vector.broadcast %cst : f32 to vector<32x64xf32>
    %27 = arith.select %25, %23, %26 : vector<32x64xi1>, vector<32x64xf32>
    %c31_i32 = arith.constant 31 : i32
    %28 = tpu.dynamic_rotate %21 by %c31_i32 dim 0 : vector<32x64xf32>, i32 -> vector<32x64xf32>
    %cst_8 = arith.constant 0.000000e+00 : f32
    %29 = vector.shape_cast %20 : vector<32x1xi1> to vector<32x1xi1>
    %30 = vector.broadcast %29 : vector<32x1xi1> to vector<32x64xi1>
    %31 = vector.broadcast %cst_8 : f32 to vector<32x64xf32>
    %32 = arith.select %30, %28, %31 : vector<32x64xi1>, vector<32x64xf32>
    %33 = tpu.concatenate %27, %21, %32 in 1 : vector<32x64xf32>, vector<32x64xf32>, vector<32x64xf32> -> vector<32x192xf32>
    %c0_9 = arith.constant 0 : index
    %c0_10 = arith.constant 0 : index
    %34 = vector.load %arg1[%c0_9, %c0_10] : memref<192x256xf32, #tpu.memory_space<vmem>>, vector<192x256xf32>
    %cst_11 = arith.constant dense<0.000000e+00> : vector<32x256xf32>
    %35 = tpu.matmul %33, %34, %cst_11 {dimension_numbers = #tpu.dot_dimension_numbers<[1], [0], [0], [1], [0, 0, 1, 1], [], []>} : vector<32x192xf32>, vector<192x256xf32>, vector<32x256xf32> -> vector<32x256xf32>
    %c0_12 = arith.constant 0 : index
    %c0_13 = arith.constant 0 : index
    %36 = vector.load %arg3[%c0_12, %c0_13] : memref<1x256xf32, #tpu.memory_space<vmem>>, vector<1x256xf32>
    %c0_14 = arith.constant 0 : index
    %c0_15 = arith.constant 0 : index
    %37 = vector.load %arg4[%c0_14, %c0_15] : memref<1x256xf32, #tpu.memory_space<vmem>>, vector<1x256xf32>
    %cst_16 = arith.constant dense<0.000000e+00> : vector<256xf32>
    %38 = vector.multi_reduction <add>, %35, %cst_16 [0] : vector<32x256xf32> to vector<256xf32>
    %39 = vector.shape_cast %38 : vector<256xf32> to vector<1x256xf32>
    %40 = arith.mulf %35, %35 : vector<32x256xf32>
    %cst_17 = arith.constant dense<0.000000e+00> : vector<256xf32>
    %41 = vector.multi_reduction <add>, %40, %cst_17 [0] : vector<32x256xf32> to vector<256xf32>
    %42 = vector.shape_cast %41 : vector<256xf32> to vector<1x256xf32>
    %43 = tpu.concatenate %39, %42 in 0 : vector<1x256xf32>, vector<1x256xf32> -> vector<2x256xf32>
    %cst_18 = arith.constant dense<0.000000e+00> : vector<2x256xf32>
    %44 = tpu.matmul %43, %22, %cst_18 {dimension_numbers = #tpu.dot_dimension_numbers<[1], [0], [0], [1], [0, 0, 1, 1], [], []>} : vector<2x256xf32>, vector<256x256xf32>, vector<2x256xf32> -> vector<2x256xf32>
    %45 = vector.extract_strided_slice %44 {offsets = [0, 0], sizes = [1, 256], strides = [1, 1]} : vector<2x256xf32> to vector<1x256xf32>
    %cst_19 = arith.constant 0.001953125 : f32
    %46 = vector.broadcast %cst_19 : f32 to vector<1x256xf32>
    %47 = arith.mulf %45, %46 : vector<1x256xf32>
    %48 = vector.extract_strided_slice %44 {offsets = [1, 0], sizes = [1, 256], strides = [1, 1]} : vector<2x256xf32> to vector<1x256xf32>
    %cst_20 = arith.constant 0.001953125 : f32
    %49 = vector.broadcast %cst_20 : f32 to vector<1x256xf32>
    %50 = arith.mulf %48, %49 : vector<1x256xf32>
    %51 = arith.mulf %47, %47 : vector<1x256xf32>
    %52 = arith.subf %50, %51 : vector<1x256xf32>
    %cst_21 = arith.constant 9.99999974E-6 : f32
    %53 = vector.broadcast %cst_21 : f32 to vector<1x256xf32>
    %54 = arith.addf %52, %53 : vector<1x256xf32>
    %55 = math.rsqrt %54 : vector<1x256xf32>
    %56 = arith.mulf %36, %55 : vector<1x256xf32>
    %57 = arith.mulf %47, %56 : vector<1x256xf32>
    %58 = arith.subf %37, %57 : vector<1x256xf32>
    %59 = vector.broadcast %56 : vector<1x256xf32> to vector<32x256xf32>
    %60 = arith.mulf %35, %59 : vector<32x256xf32>
    %61 = vector.broadcast %58 : vector<1x256xf32> to vector<32x256xf32>
    %62 = arith.addf %60, %61 : vector<32x256xf32>
    %63 = vector.extract_strided_slice %62 {offsets = [0, 0], sizes = [32, 128], strides = [1, 1]} : vector<32x256xf32> to vector<32x128xf32>
    %cst_22 = arith.constant 0.000000e+00 : f32
    %64 = vector.broadcast %cst_22 : f32 to vector<32x128xf32>
    %65 = arith.maximumf %63, %64 : vector<32x128xf32>
    %66 = vector.extract_strided_slice %62 {offsets = [0, 128], sizes = [32, 128], strides = [1, 1]} : vector<32x256xf32> to vector<32x128xf32>
    %c1_i32_23 = arith.constant 1 : i32
    %67 = tpu.dynamic_rotate %65 by %c1_i32_23 dim 0 : vector<32x128xf32>, i32 -> vector<32x128xf32>
    %cst_24 = arith.constant 0.000000e+00 : f32
    %68 = vector.shape_cast %18 : vector<32x1xi1> to vector<32x1xi1>
    %69 = vector.broadcast %68 : vector<32x1xi1> to vector<32x128xi1>
    %70 = vector.broadcast %cst_24 : f32 to vector<32x128xf32>
    %71 = arith.select %69, %67, %70 : vector<32x128xi1>, vector<32x128xf32>
    %c31_i32_25 = arith.constant 31 : i32
    %72 = tpu.dynamic_rotate %65 by %c31_i32_25 dim 0 : vector<32x128xf32>, i32 -> vector<32x128xf32>
    %cst_26 = arith.constant 0.000000e+00 : f32
    %73 = vector.shape_cast %20 : vector<32x1xi1> to vector<32x1xi1>
    %74 = vector.broadcast %73 : vector<32x1xi1> to vector<32x128xi1>
    %75 = vector.broadcast %cst_26 : f32 to vector<32x128xf32>
    %76 = arith.select %74, %72, %75 : vector<32x128xi1>, vector<32x128xf32>
    %77 = tpu.concatenate %71, %65, %76 in 1 : vector<32x128xf32>, vector<32x128xf32>, vector<32x128xf32> -> vector<32x384xf32>
    %c0_27 = arith.constant 0 : index
    %c0_28 = arith.constant 0 : index
    %78 = vector.load %arg2[%c0_27, %c0_28] : memref<384x128xf32, #tpu.memory_space<vmem>>, vector<384x128xf32>
    %cst_29 = arith.constant dense<0.000000e+00> : vector<32x128xf32>
    %79 = tpu.matmul %77, %78, %cst_29 {dimension_numbers = #tpu.dot_dimension_numbers<[1], [0], [0], [1], [0, 0, 1, 1], [], []>} : vector<32x384xf32>, vector<384x128xf32>, vector<32x128xf32> -> vector<32x128xf32>
    %c0_30 = arith.constant 0 : index
    %c0_31 = arith.constant 0 : index
    %80 = vector.load %arg5[%c0_30, %c0_31] : memref<1x128xf32, #tpu.memory_space<vmem>>, vector<1x128xf32>
    %c0_32 = arith.constant 0 : index
    %c0_33 = arith.constant 0 : index
    %81 = vector.load %arg6[%c0_32, %c0_33] : memref<1x128xf32, #tpu.memory_space<vmem>>, vector<1x128xf32>
    %82 = vector.extract_strided_slice %22 {offsets = [0, 0], sizes = [128, 128], strides = [1, 1]} : vector<256x256xf32> to vector<128x128xf32>
    %cst_34 = arith.constant dense<0.000000e+00> : vector<128xf32>
    %83 = vector.multi_reduction <add>, %79, %cst_34 [0] : vector<32x128xf32> to vector<128xf32>
    %84 = vector.shape_cast %83 : vector<128xf32> to vector<1x128xf32>
    %85 = arith.mulf %79, %79 : vector<32x128xf32>
    %cst_35 = arith.constant dense<0.000000e+00> : vector<128xf32>
    %86 = vector.multi_reduction <add>, %85, %cst_35 [0] : vector<32x128xf32> to vector<128xf32>
    %87 = vector.shape_cast %86 : vector<128xf32> to vector<1x128xf32>
    %88 = tpu.concatenate %84, %87 in 0 : vector<1x128xf32>, vector<1x128xf32> -> vector<2x128xf32>
    %cst_36 = arith.constant dense<0.000000e+00> : vector<2x128xf32>
    %89 = tpu.matmul %88, %82, %cst_36 {dimension_numbers = #tpu.dot_dimension_numbers<[1], [0], [0], [1], [0, 0, 1, 1], [], []>} : vector<2x128xf32>, vector<128x128xf32>, vector<2x128xf32> -> vector<2x128xf32>
    %90 = vector.extract_strided_slice %89 {offsets = [0, 0], sizes = [1, 128], strides = [1, 1]} : vector<2x128xf32> to vector<1x128xf32>
    %cst_37 = arith.constant 0.001953125 : f32
    %91 = vector.broadcast %cst_37 : f32 to vector<1x128xf32>
    %92 = arith.mulf %90, %91 : vector<1x128xf32>
    %93 = vector.extract_strided_slice %89 {offsets = [1, 0], sizes = [1, 128], strides = [1, 1]} : vector<2x128xf32> to vector<1x128xf32>
    %cst_38 = arith.constant 0.001953125 : f32
    %94 = vector.broadcast %cst_38 : f32 to vector<1x128xf32>
    %95 = arith.mulf %93, %94 : vector<1x128xf32>
    %96 = arith.mulf %92, %92 : vector<1x128xf32>
    %97 = arith.subf %95, %96 : vector<1x128xf32>
    %cst_39 = arith.constant 9.99999974E-6 : f32
    %98 = vector.broadcast %cst_39 : f32 to vector<1x128xf32>
    %99 = arith.addf %97, %98 : vector<1x128xf32>
    %100 = math.rsqrt %99 : vector<1x128xf32>
    %101 = arith.mulf %80, %100 : vector<1x128xf32>
    %102 = arith.mulf %92, %101 : vector<1x128xf32>
    %103 = arith.subf %81, %102 : vector<1x128xf32>
    %104 = vector.broadcast %101 : vector<1x128xf32> to vector<32x128xf32>
    %105 = arith.mulf %79, %104 : vector<32x128xf32>
    %106 = vector.broadcast %103 : vector<1x128xf32> to vector<32x128xf32>
    %107 = arith.addf %105, %106 : vector<32x128xf32>
    %108 = arith.addf %107, %66 : vector<32x128xf32>
    %cst_40 = arith.constant 0.000000e+00 : f32
    %109 = vector.broadcast %cst_40 : f32 to vector<32x128xf32>
    %110 = arith.maximumf %108, %109 : vector<32x128xf32>
    %c0_41 = arith.constant 0 : index
    %c0_42 = arith.constant 0 : index
    %111 = vector.load %arg8[%c0_41, %c0_42] : memref<32x128xf32, #tpu.memory_space<vmem>>, vector<32x128xf32>
    tpu.vector_store %arg8[%c0_41, %c0_42], %110 {strides = array<i32>} : memref<32x128xf32, #tpu.memory_space<vmem>>, vector<32x128xf32>,
    return
  }
}

</mosaic_0001>

<bundles_post_ra>
// kernel: tpu_custom_call.1
= control target key start
LH: loop header
LB: loop body
LE: loop exit
PB: predicated region body
PF: predicated region fallthrough
CT: control target
= control target key end

     0   :  { %13 = vsyncpa [#allocation3], 0  ;;  %s1501_s0 = inlined_call_operand.hbm [shape: f32[32,64], index: 0, kind: input, shape index: {}]   ;;  %s1502_s1 = inlined_call_operand.hbm [shape: f32[192,256], index: 1, kind: input, shape index: {}]   ;;  %s1503_s2 = inlined_call_operand.hbm [shape: f32[384,128], index: 2, kind: input, shape index: {}]   ;;  %s1504_s3 = inlined_call_operand.vmem [shape: f32[1,256], index: 3, kind: input, shape index: {}]   ;;  %s1505_s4 = inlined_call_operand.hbm [shape: f32[1,256], index: 4, kind: input, shape index: {}]   ;;  %s1506_s5 = inlined_call_operand.vmem [shape: f32[1,128], index: 5, kind: input, shape index: {}]   ;;  %s1507_s6 = inlined_call_operand.vmem [shape: f32[1,128], index: 6, kind: input, shape index: {}]   ;;  %s1508_s7 = inlined_call_operand.hbm [shape: f32[256,256], index: 7, kind: input, shape index: {}]   ;;  %s1509_s8 = inlined_call_operand.hbm [shape: f32[32,128], index: 8, kind: output, shape index: {}]  }
   0x1   :  { %14 = vsyncpa [#allocation6], 0 }
   0x2   :  { %15 = vsyncpa [#allocation9], 0  ;;  %s34_s29 = sshll.u32 %s1502_s1, 4  ;;  %s35_s29 = int_to_ptr.hbm [resolvable:$true] %s34_s29 }
   0x3   :  { %16 = vsyncpa [#allocation4], 0  ;;  %s1140_s30 = smov [#allocation5]   ;;  %s63_s12 = sshll.u32 %s1505_s4, 4  ;;  %s64_s12 = int_to_ptr.hbm [resolvable:$true] %s63_s12 }
   0x4   :  { %s36_s9 = sshll.u32 %s1140_s30, 4  ;;  %s1141_s13 = smov 256   ;;  %s37_s9 = int_to_ptr.vmem [resolvable:$true] %s36_s9 }
   0x5   :  { %s1142_s14 = smov 16   ;;  %s1143_s15 = smov [#allocation8]  }
   0x6   :  { %42 = dma.hbm_to_vmem [thread:$0]  %s35_s29, 6144, %s37_s9, [#allocation6], %s1141_s13, %s1141_s13, %s1142_s14  }
   0x7   :  { %s65_s16 = sshll.u32 %s1143_s15, 4  ;;  %s21_s18 = sshll.u32 %s1501_s0, 4  ;;  %s66_s16 = int_to_ptr.vmem [resolvable:$true] %s65_s16  ;;  %s22_s18 = int_to_ptr.hbm [resolvable:$true] %s21_s18 }
   0x8   :  { %68 = dma.hbm_to_vmem [thread:$0]  %s64_s12, 32, %s66_s16, [#allocation9]  }
   0x9   :  { %s1144_s19 = smov [#allocation2]   ;;  %s47_s22 = sshll.u32 %s1503_s2, 4  ;;  %s48_s22 = int_to_ptr.hbm [resolvable:$true] %s47_s22 }
   0xa   :  { %s23_s20 = sshll.u32 %s1144_s19, 4  ;;  %s1145_s23 = smov 128   ;;  %s24_s20 = int_to_ptr.vmem [resolvable:$true] %s23_s20 }
   0xb   :  { %s1146_s24 = smov 8   ;;  %s1147_s25 = smov [#allocation7]  }
   0xc   :  { %29 = dma.hbm_to_vmem [thread:$0]  %s22_s18, 512, %s24_s20, [#allocation3], %s1145_s23, %s1145_s23, %s1146_s24  }
   0xd   :  { %s49_s26 = sshll.u32 %s1147_s25, 4  ;;  %s77_s28 = sshll.u32 %s1508_s7, 4  ;;  %s50_s26 = int_to_ptr.vmem [resolvable:$true] %s49_s26  ;;  %s78_s28 = int_to_ptr.hbm [resolvable:$true] %s77_s28 }
   0xe   :  { %55 = dma.hbm_to_vmem [thread:$0]  %s48_s22, 6144, %s50_s26, [#allocation6], %s1145_s23, %s1145_s23, %s1146_s24  }
   0xf   :  { %s1148_s2 = smov [#allocation10]  }
  0x10   :  { %s79_s29 = sshll.u32 %s1148_s2, 4  ;;  %s80_s29 = int_to_ptr.vmem [resolvable:$true] %s79_s29 }
  0x11   :  { %85 = dma.hbm_to_vmem [thread:$0]  %s78_s28, 8192, %s80_s29, [#allocation9], %s1141_s13, %s1141_s13, %s1142_s14  }
  0x12   :  { %1132 = dma.done.wait [#allocation3], 512  }
  0x13   :  { %1133 = vsyncadd [#allocation3], 4294966784 }
  0x14   :  { %1134 = dma.done.wait [#allocation6], 12288  }
  0x15   :  { %1135 = vsyncadd [#allocation6], 4294955008 }
  0x16   :  { %1136 = dma.done.wait [#allocation9], 8224  }
  0x17   :  { %1137 = vsyncadd [#allocation9], 4294959072  ;;  %v1223_v0 = vld [vmem:[#allocation2] sm:$0xff]  ;;  %v1225_v1 = vld [vmem:[#allocation2 + $0x10] sm:$0xff]  ;;  %s1149_s7 = smov 64   ;;  %v106_v48 = vlaneseq  ;;  %vm293_vm1 = vcmask 523264  }
  0x18   :  { %281 = vrot.lane.b32.xlu0 %v1223_v0, %s1149_s7  ;;  %285 = vrot.lane.b32.xlu1 %v1225_v1, %s1149_s7  ;;  %v328_v2 = vld [vmem:[#allocation5 + $0xf0] sm:$0xff]  ;;  %v329_v3 = vld [vmem:[#allocation5 + $0xf8] sm:$0xff]  ;;  %v326_v4 = vld [vmem:[#allocation5 + $0xe0] sm:$0xff]  ;;  %v235_v49 = vrot.slane %v1223_v0, 7  ;;  %v256_v52 = vrot.slane %v1223_v0, 1  ;;  %v258_v61 = vrot.slane %v1225_v1, 1 }
  0x19   :  { %358 = vmatpush.msra.mxu0 %v328_v2  ;;  %416 = vmatpush.msra.mxu2 %v329_v3  ;;  %v327_v5 = vld [vmem:[#allocation5 + $0xe8] sm:$0xff]  ;;  %v324_v6 = vld [vmem:[#allocation5 + $0xd0] sm:$0xff]  ;;  %v325_v7 = vld [vmem:[#allocation5 + $0xd8] sm:$0xff]  ;;  %v1237_v51 = vshrl.u32 %v106_v48, 7  ;;  %v237_v63 = vrot.slane %v1225_v1, 7  ;;  %vm520_vm7 = vcmask 1040384  }
  0x1a   :  { %v322_v8 = vld [vmem:[#allocation5 + $0xc0] sm:$0xff]  ;;  %v1229_v9 = vld [vmem:[#allocation2 + $0x8] sm:$0xff]  ;;  %v1231_v10 = vld [vmem:[#allocation2 + $0x18] sm:$0xff]  ;;  %s944_s15 = sshll.u32 %s1509_s8, 4  ;;  %s945_s15 = int_to_ptr.hbm [resolvable:$true] %s944_s15 }
  0x1b   :  { %359 = vmatpush.msra.mxu0 %v326_v4  ;;  %417 = vmatpush.msra.mxu2 %v327_v5  ;;  %v323_v11 = vld [vmem:[#allocation5 + $0xc8] sm:$0xff]  ;;  %v320_v12 = vld [vmem:[#allocation5 + $0xb0] sm:$0xff]  ;;  %v345_v14 = vld [vmem:[#allocation5 + $0x178] sm:$0xff]  ;;  %v238_v50 = vrot.slane %v1231_v10, 7  ;;  %v257_v53 = vrot.slane %v1229_v9, 1  ;;  %vm239_vm0 = vcmp.lt.s32.totalorder %v1237_v51, 1 }
  0x1c   :  { %v344_v13 = vld [vmem:[#allocation5 + $0x170] sm:$0xff]  ;;  %v321_v15 = vld [vmem:[#allocation5 + $0xb8] sm:$0xff]  ;;  %v318_v16 = vld [vmem:[#allocation5 + $0xa0] sm:$0xff]  ;;  %453 = vmatpush.msra.mxu3 %v345_v14  ;;  %vm260_vm2 = vcmp.lt.s32.totalorder %v1237_v51, 7  ;;  %v236_v60 = vrot.slane %v1229_v9, 7  ;;  %v108_v62 = vadd.s32 8, %v1237_v51 }
  0x1d   :  { %360 = vmatpush.msra.mxu0 %v324_v6  ;;  %418 = vmatpush.msra.mxu2 %v325_v7  ;;  %v342_v17 = vld [vmem:[#allocation5 + $0x160] sm:$0xff]  ;;  %v343_v18 = vld [vmem:[#allocation5 + $0x168] sm:$0xff]  ;;  %v340_v19 = vld [vmem:[#allocation5 + $0x150] sm:$0xff]  ;;  %v243_v54 = vsel %vm239_vm0, %v238_v50, %v235_v49  ;;  %v263_v59 = vsel %vm260_vm2, %v256_v52, %v257_v53  ;;  %v262_v4 = vsel %vm260_vm2, %v257_v53, %v258_v61  ;;  %v259_v1 = vrot.slane %v1231_v10, 1 }
  0x1e   :  { %395 = vmatpush.msra.mxu1 %v344_v13  ;;  %v319_v20 = vld [vmem:[#allocation5 + $0xa8] sm:$0xff]  ;;  %v316_v21 = vld [vmem:[#allocation5 + $0x90] sm:$0xff]  ;;  %v341_v22 = vld [vmem:[#allocation5 + $0x158] sm:$0xff]  ;;  %454 = vmatpush.msra.mxu3 %v343_v18  ;;  %v122_v0 = vand.u32 15, %v108_v62  ;;  %v242_v2 = vsel %vm239_vm0, %v235_v49, %v236_v60  ;;  %v241_v6 = vsel %vm239_vm0, %v236_v60, %v237_v63 }
  0x1f   :  { %361 = vmatpush.msra.mxu0 %v322_v8  ;;  %419 = vmatpush.msra.mxu2 %v323_v11  ;;  %v338_v23 = vld [vmem:[#allocation5 + $0x140] sm:$0xff]  ;;  %v317_v24 = vld [vmem:[#allocation5 + $0x98] sm:$0xff]  ;;  %v339_v26 = vld [vmem:[#allocation5 + $0x148] sm:$0xff]  ;;  %v261_v7 = vsel %vm260_vm2, %v258_v61, %v259_v1  ;;  %v240_v8 = vsel %vm239_vm0, %v237_v63, %v238_v50 }
  0x20   :  { %283 = vrot.lane.b32.xlu0 %v1229_v9, %s1149_s7  ;;  %287 = vrot.lane.b32.xlu1 %v1231_v10, %s1149_s7  ;;  %v314_v25 = vld [vmem:[#allocation5 + $0x80] sm:$0xff]  ;;  %v336_v27 = vld [vmem:[#allocation5 + $0x130] sm:$0xff]  ;;  %v315_v28 = vld [vmem:[#allocation5 + $0x88] sm:$0xff]  ;;  %vm1255_vm3 = vcmp.lt.s32.totalorder %v122_v0, 15  ;;  %v110_v9 = vadd.s32 24, %v1237_v51  ;;  %v264_v10 = vsel %vm260_vm2, %v259_v1, %v256_v52 }
  0x21   :  { %362 = vmatpush.msra.mxu0 %v320_v12  ;;  %396 = vmatpush.msra.mxu1 %v342_v17  ;;  %v312_v29 = vld [vmem:[#allocation5 + $0x70] sm:$0xff]  ;;  %v337_v30 = vld [vmem:[#allocation5 + $0x138] sm:$0xff]  ;;  %v334_v31 = vld [vmem:[#allocation5 + $0x120] sm:$0xff]  ;;  %v274_v5 = vsel %vm1255_vm3, %v262_v4, 0.0  ;;  %v115_v12 = vand.u32 15, %v1237_v51 }
  0x22   :  { %420 = vmatpush.msra.mxu2 %v321_v15  ;;  %455 = vmatpush.msra.mxu3 %v341_v22  ;;  %v313_v32 = vld [vmem:[#allocation5 + $0x78] sm:$0xff]  ;;  %v310_v33 = vld [vmem:[#allocation5 + $0x60] sm:$0xff]  ;;  %v335_v34 = vld [vmem:[#allocation5 + $0x128] sm:$0xff]  ;;  %v136_v11 = vand.u32 15, %v110_v9 }
  0x23   :  { %363 = vmatpush.msra.mxu0 %v318_v16  ;;  %397 = vmatpush.msra.mxu1 %v340_v19  ;;  %v332_v35 = vld [vmem:[#allocation5 + $0x110] sm:$0xff]  ;;  %v311_v36 = vld [vmem:[#allocation5 + $0x68] sm:$0xff]  ;;  %v333_v38 = vld [vmem:[#allocation5 + $0x118] sm:$0xff]  ;;  %vm1284_vm5 = vcmp.gt.s32.totalorder %v115_v12, 0  ;;  %v109_v19 = vadd.s32 16, %v1237_v51 }
  0x24   :  { %421 = vmatpush.msra.mxu2 %v319_v20  ;;  %456 = vmatpush.msra.mxu3 %v339_v26  ;;  %v308_v37 = vld [vmem:[#allocation5 + $0x50] sm:$0xff]  ;;  %v309_v39 = vld [vmem:[#allocation5 + $0x58] sm:$0xff]  ;;  %v306_v40 = vld [vmem:[#allocation5 + $0x40] sm:$0xff]  ;;  %vm1276_vm4 = vcmp.lt.s32.totalorder %v136_v11, 15  ;;  %v252_v16 = vsel %vm1284_vm5, %v243_v54, 0.0 }
  0x25   :  { %364 = vmatpush.msra.mxu0 %v316_v21  ;;  %398 = vmatpush.msra.mxu1 %v338_v23  ;;  %v307_v41 = vld [vmem:[#allocation5 + $0x48] sm:$0xff]  ;;  %v304_v42 = vld [vmem:[#allocation5 + $0x30] sm:$0xff]  ;;  %v305_v43 = vld [vmem:[#allocation5 + $0x38] sm:$0xff]  ;;  %v276_v14 = vsel %vm1276_vm4, %v264_v10, 0.0  ;;  %v129_v20 = vand.u32 15, %v109_v19 }
  0x26   :  { %422 = vmatpush.msra.mxu2 %v317_v24  ;;  %457 = vmatpush.msra.mxu3 %v337_v30  ;;  %v302_v44 = vld [vmem:[#allocation5 + $0x20] sm:$0xff]  ;;  %v303_v45 = vld [vmem:[#allocation5 + $0x28] sm:$0xff]  ;;  %v300_v46 = vld [vmem:[#allocation5 + $0x10] sm:$0xff] }
  0x27   :  { %365 = vmatpush.msra.mxu0 %v314_v25  ;;  %399 = vmatpush.msra.mxu1 %v336_v27  ;;  %v301_v47 = vld [vmem:[#allocation5 + $0x18] sm:$0xff]  ;;  %v298_v55 = vld [vmem:[#allocation5] sm:$0xff]  ;;  %v299_v57 = vld [vmem:[#allocation5 + $0x8] sm:$0xff]  ;;  %vm1295_vm6 = vcmp.gt.s32.totalorder %v129_v20, 0 }
  0x28   :  { %423 = vmatpush.msra.mxu2 %v315_v28  ;;  %458 = vmatpush.msra.mxu3 %v335_v34  ;;  %v330_v56 = vld [vmem:[#allocation5 + $0x100] sm:$0xff]  ;;  %v331_v58 = vld [vmem:[#allocation5 + $0x108] sm:$0xff]  ;;  %v254_v25 = vsel %vm1295_vm6, %v241_v6, 0.0  ;;  %v1323_v50 = vld [vmem:[#allocation10 + $0x90] sm:$0xff] }
  0x29   :  { %366 = vmatpush.msra.mxu0 %v312_v29  ;;  %400 = vmatpush.msra.mxu1 %v334_v31  ;;  %v1303_v29 = vld [vmem:[#allocation10 + $0xf0] sm:$0xff]  ;;  %v202_v30 = vld [vmem:[#allocation10 + $0xf8] sm:$0xff]  ;;  %v1306_v31 = vld [vmem:[#allocation10 + $0xe0] sm:$0xff] }
  0x2a   :  { %424 = vmatpush.msra.mxu2 %v313_v32  ;;  %459 = vmatpush.msra.mxu3 %v333_v38  ;;  %v200_v32 = vld [vmem:[#allocation10 + $0xe8] sm:$0xff]  ;;  %v198_v34 = vld [vmem:[#allocation10 + $0xd8] sm:$0xff]  ;;  %v227_v48 = vld [vmem:[#allocation10 + $0x1c0] sm:$0xff] }
  0x2b   :  { %367 = vmatpush.msra.mxu0 %v310_v33  ;;  %401 = vmatpush.msra.mxu1 %v332_v35  ;;  %v1309_v33 = vld [vmem:[#allocation10 + $0xd0] sm:$0xff]  ;;  %v196_v38 = vld [vmem:[#allocation10 + $0xc8] sm:$0xff]  ;;  %v190_v52 = vld [vmem:[#allocation10 + $0x98] sm:$0xff] }
  0x2c   :  { %425 = vmatpush.msra.mxu2 %v311_v36  ;;  %460 = vmatpush.msra.mxu3 %v331_v58  ;;  %v233_v35 = vld [vmem:[#allocation10 + $0x1f0] sm:$0xff]  ;;  %v234_v36 = vld [vmem:[#allocation10 + $0x1f8] sm:$0xff]  ;;  %v228_v49 = vld [vmem:[#allocation10 + $0x1c8] sm:$0xff] }
  0x2d   :  { %368 = vmatpush.msra.mxu0 %v308_v37  ;;  %402 = vmatpush.msra.mxu1 %v330_v56  ;;  %v1312_v37 = vld [vmem:[#allocation10 + $0xc0] sm:$0xff]  ;;  %v225_v53 = vld [vmem:[#allocation10 + $0x1b0] sm:$0xff]  ;;  %v226_v54 = vld [vmem:[#allocation10 + $0x1b8] sm:$0xff] }
  0x2e   :  { %426 = vmatpush.msra.mxu2 %v309_v39  ;;  %959 = vmatmul.msk.f32.vlgmr.msra.gmra.mxu1 %vm293_vm1, %v263_v59  ;;  %v231_v39 = vld [vmem:[#allocation10 + $0x1e0] sm:$0xff]  ;;  %v188_v56 = vld [vmem:[#allocation10 + $0x88] sm:$0xff]  ;;  %v186_v60 = vld [vmem:[#allocation10 + $0x78] sm:$0xff] }
  0x2f   :  { %369 = vmatpush.msra.mxu0 %v306_v40  ;;  %963 = vmatmul.msk.f32.vlgmr.msra.gmra.mxu3 %vm293_vm1, %v263_v59  ;;  %v232_v40 = vld [vmem:[#allocation10 + $0x1e8] sm:$0xff]  ;;  %v1329_v59 = vld [vmem:[#allocation10 + $0x70] sm:$0xff]  ;;  %v222_v63 = vld [vmem:[#allocation10 + $0x198] sm:$0xff] }
  0x30   :  { %427 = vmatpush.msra.mxu2 %v307_v41  ;;  %523 = vmatpush.msrb.mxu1 %v1303_v29  ;;  %v1315_v41 = vld [vmem:[#allocation10 + $0xb0] sm:$0xff]  ;;  %v224_v58 = vld [vmem:[#allocation10 + $0x1a8] sm:$0xff]  ;;  %v1334_v0 = vld [vmem:[#allocation10 + $0x60] sm:$0xff] }
  0x31   :  { %370 = vmatpush.msra.mxu0 %v304_v42  ;;  %543 = vmatpush.msrb.mxu3 %v233_v35  ;;  %v194_v42 = vld [vmem:[#allocation10 + $0xb8] sm:$0xff]  ;;  %v221_v62 = vld [vmem:[#allocation10 + $0x190] sm:$0xff]  ;;  %v220_v6 = vld [vmem:[#allocation10 + $0x188] sm:$0xff] }
  0x32   :  { %428 = vmatpush.msra.mxu2 %v305_v43  ;;  %524 = vmatpush.msrb.mxu1 %v1306_v31  ;;  %v229_v43 = vld [vmem:[#allocation10 + $0x1d0] sm:$0xff]  ;;  %v218_v11 = vld [vmem:[#allocation10 + $0x178] sm:$0xff]  ;;  %v1342_v12 = vld [vmem:[#allocation10 + $0x40] sm:$0xff] }
  0x33   :  { %371 = vmatpush.msra.mxu0 %v302_v44  ;;  %544 = vmatpush.msrb.mxu3 %v231_v39  ;;  %v230_v44 = vld [vmem:[#allocation10 + $0x1d8] sm:$0xff]  ;;  %v1339_v1 = vld [vmem:[#allocation10 + $0x50] sm:$0xff]  ;;  %v180_v10 = vld [vmem:[#allocation10 + $0x48] sm:$0xff] }
  0x34   :  { %429 = vmatpush.msra.mxu2 %v303_v45  ;;  %525 = vmatpush.msrb.mxu1 %v1309_v33  ;;  %v1318_v45 = vld [vmem:[#allocation10 + $0xa0] sm:$0xff]  ;;  %v217_v9 = vld [vmem:[#allocation10 + $0x170] sm:$0xff]  ;;  %v210_v35 = vld [vmem:[#allocation10 + $0x138] sm:$0xff] }
  0x35   :  { %372 = vmatpush.msra.mxu0 %v300_v46  ;;  %545 = vmatpush.msrb.mxu3 %v229_v43  ;;  %v192_v46 = vld [vmem:[#allocation10 + $0xa8] sm:$0xff]  ;;  %v213_v20 = vld [vmem:[#allocation10 + $0x150] sm:$0xff] }
  0x36   :  { %430 = vmatpush.msra.mxu2 %v301_v47  ;;  %960 = vmatmul.msk.f32.gmra.mxu1 %vm293_vm1, %v274_v5  ;;  %v205_v43 = vld [vmem:[#allocation10 + $0x110] sm:$0xff] }
  0x37   :  { %373 = vmatpush.msra.mxu0 %v298_v55  ;;  %964 = vmatmul.msk.f32.gmra.mxu3 %vm293_vm1, %v274_v5  ;;  %v1326_v55 = vld [vmem:[#allocation10 + $0x80] sm:$0xff] }
  0x38   :  { %431 = vmatpush.msra.mxu2 %v299_v57  ;;  %526 = vmatpush.msrb.mxu1 %v1312_v37  ;;  %v223_v57 = vld [vmem:[#allocation10 + $0x1a0] sm:$0xff] }
  0x39   :  { %563 = vmatpush.msrb.mxu0 %v202_v30  ;;  %546 = vmatpush.msrb.mxu3 %v227_v48  ;;  %v219_v5 = vld [vmem:[#allocation10 + $0x180] sm:$0xff]  ;;  %v1351_v30 = vld [vmem:[#allocation10 + $0x10] sm:$0xff] }
  0x3a   :  { %583 = vmatpush.msrb.mxu2 %v234_v36  ;;  %527 = vmatpush.msrb.mxu1 %v1315_v41  ;;  %v1353_v36 = vld [vmem:[#allocation10] sm:$0xff] }
  0x3b   :  { %564 = vmatpush.msrb.mxu0 %v200_v32  ;;  %547 = vmatpush.msrb.mxu3 %v225_v53  ;;  %v174_v32 = vld [vmem:[#allocation10 + $0x18] sm:$0xff]  ;;  %v203_v48 = vld [vmem:[#allocation10 + $0x100] sm:$0xff] }
  0x3c   :  { %584 = vmatpush.msrb.mxu2 %v232_v40  ;;  %528 = vmatpush.msrb.mxu1 %v1318_v45  ;;  %v207_v40 = vld [vmem:[#allocation10 + $0x120] sm:$0xff] }
  0x3d   :  { %565 = vmatpush.msrb.mxu0 %v198_v34  ;;  %548 = vmatpush.msrb.mxu3 %v223_v57  ;;  %v209_v34 = vld [vmem:[#allocation10 + $0x130] sm:$0xff] }
  0x3e   :  { %961 = vmatmul.msk.f32.gmra.mxu1 %vm293_vm1, %v261_v7  ;;  %585 = vmatpush.msrb.mxu2 %v230_v44  ;;  %v206_v44 = vld [vmem:[#allocation10 + $0x118] sm:$0xff] }
  0x3f   :  { %965 = vmatmul.msk.f32.gmra.mxu3 %vm293_vm1, %v261_v7  ;;  %566 = vmatpush.msrb.mxu0 %v196_v38  ;;  %v182_v7 = vld [vmem:[#allocation10 + $0x58] sm:$0xff]  ;;  %v172_v38 = vld [vmem:[#allocation10 + $0x8] sm:$0xff] }
  0x40   :  { %586 = vmatpush.msrb.mxu2 %v228_v49  ;;  %529 = vmatpush.msrb.mxu1 %v1323_v50  ;;  %v204_v49 = vld [vmem:[#allocation10 + $0x108] sm:$0xff] }
  0x41   :  { %567 = vmatpush.msrb.mxu0 %v194_v42  ;;  %549 = vmatpush.msrb.mxu3 %v221_v62  ;;  %v208_v42 = vld [vmem:[#allocation10 + $0x128] sm:$0xff] }
  0x42   :  { %587 = vmatpush.msrb.mxu2 %v226_v54  ;;  %530 = vmatpush.msrb.mxu1 %v1326_v55 }
  0x43   :  { %568 = vmatpush.msrb.mxu0 %v192_v46  ;;  %550 = vmatpush.msrb.mxu3 %v219_v5 }
  0x44   :  { %588 = vmatpush.msrb.mxu2 %v224_v58  ;;  %531 = vmatpush.msrb.mxu1 %v1329_v59 }
  0x45   :  { %569 = vmatpush.msrb.mxu0 %v190_v52  ;;  %551 = vmatpush.msrb.mxu3 %v217_v9 }
  0x46   :  { %962 = vmatmul.msk.f32.gmra.mxu1 %vm293_vm1, %v276_v14  ;;  %589 = vmatpush.msrb.mxu2 %v222_v63 }
  0x47   :  { %966 = vmatmul.msk.f32.gmra.mxu3 %vm293_vm1, %v276_v14  ;;  %570 = vmatpush.msrb.mxu0 %v188_v56  ;;  %v215_v14 = vld [vmem:[#allocation10 + $0x160] sm:$0xff] }
  0x48   :  { %532 = vmatpush.msrb.mxu1 %v1334_v0  ;;  %590 = vmatpush.msrb.mxu2 %v220_v6 }
  0x49   :  { %571 = vmatpush.msrb.mxu0 %v186_v60  ;;  %552 = vmatpush.msrb.mxu3 %v215_v14 }
  0x4a   :  { %533 = vmatpush.msrb.mxu1 %v1339_v1  ;;  %591 = vmatpush.msrb.mxu2 %v218_v11 }
  0x4b   :  { %553 = vmatpush.msrb.mxu3 %v213_v20 }
  0x4c   :  { %534 = vmatpush.msrb.mxu1 %v1342_v12 }
  0x8a   :  { %v282_v17 = vpop.permute.xlu0 %281  ;;  %v286_v24 = vpop.permute.xlu1 %285 }
  0x8b   :  { %v294_v18 = vsel %vm293_vm1, %v252_v16, %v282_v17  ;;  %v296_v26 = vsel %vm293_vm1, %v254_v25, %v286_v24  ;;  %v216_v16 = vld [vmem:[#allocation10 + $0x168] sm:$0xff]  ;;  %v1345_v17 = vld [vmem:[#allocation10 + $0x30] sm:$0xff]  ;;  %v211_v25 = vld [vmem:[#allocation10 + $0x140] sm:$0xff] }
  0x8c   :  { %374 = vmatmul.f32.vlgmr.msra.gmra.mxu0 %v294_v18  ;;  %432 = vmatmul.f32.vlgmr.msra.gmra.mxu2 %v294_v18  ;;  %v178_v18 = vld [vmem:[#allocation10 + $0x38] sm:$0xff]  ;;  %v176_v24 = vld [vmem:[#allocation10 + $0x28] sm:$0xff] }
  0x8d   :  { %592 = vmatpush.msrb.mxu2 %v216_v16  ;;  %535 = vmatpush.msrb.mxu1 %v1345_v17 }
  0x8e   :  { %554 = vmatpush.msrb.mxu3 %v211_v25 }
  0x90   :  { %555 = vmatpush.msrb.mxu3 %v209_v34 }
  0x92   :  { %v284_v21 = vpop.permute.xlu0 %283  ;;  %v288_v27 = vpop.permute.xlu1 %287  ;;  %556 = vmatpush.msrb.mxu3 %v207_v40 }
  0x93   :  { %v295_v22 = vsel %vm293_vm1, %v242_v2, %v284_v21  ;;  %v297_v28 = vsel %vm293_vm1, %v240_v8, %v288_v27  ;;  %v184_v2 = vld [vmem:[#allocation10 + $0x68] sm:$0xff]  ;;  %v214_v21 = vld [vmem:[#allocation10 + $0x158] sm:$0xff] }
  0x94   :  { %377 = vmatmul.f32.gmra.mxu0 %v295_v22  ;;  %435 = vmatmul.f32.gmra.mxu2 %v295_v22  ;;  %v1348_v22 = vld [vmem:[#allocation10 + $0x20] sm:$0xff] }
  0x95   :  { %572 = vmatpush.msrb.mxu0 %v184_v2  ;;  %593 = vmatpush.msrb.mxu2 %v214_v21 }
  0x96   :  { %536 = vmatpush.msrb.mxu1 %v1348_v22  ;;  %557 = vmatpush.msrb.mxu3 %v205_v43 }
  0x97   :  { %573 = vmatpush.msrb.mxu0 %v182_v7 }
  0x98   :  { %537 = vmatpush.msrb.mxu1 %v1351_v30  ;;  %558 = vmatpush.msrb.mxu3 %v203_v48 }
  0x99   :  { %574 = vmatpush.msrb.mxu0 %v180_v10 }
  0x9a   :  { %538 = vmatpush.msrb.mxu1 %v1353_v36 }
  0x9b   :  { %575 = vmatpush.msrb.mxu0 %v178_v18 }
  0x9c   :  { %380 = vmatmul.f32.gmra.mxu0 %v296_v26  ;;  %438 = vmatmul.f32.gmra.mxu2 %v296_v26  ;;  %v212_v26 = vld [vmem:[#allocation10 + $0x148] sm:$0xff] }
  0x9d   :  { %576 = vmatpush.msrb.mxu0 %v176_v24  ;;  %594 = vmatpush.msrb.mxu2 %v212_v26 }
  0x9f   :  { %577 = vmatpush.msrb.mxu0 %v174_v32  ;;  %595 = vmatpush.msrb.mxu2 %v210_v35 }
  0xa1   :  { %578 = vmatpush.msrb.mxu0 %v172_v38  ;;  %596 = vmatpush.msrb.mxu2 %v208_v42 }
  0xa3   :  { %597 = vmatpush.msrb.mxu2 %v206_v44 }
  0xa4   :  { %383 = vmatmul.f32.gmra.mxu0 %v297_v28  ;;  %441 = vmatmul.f32.gmra.mxu2 %v297_v28 }
  0xa5   :  { %598 = vmatpush.msrb.mxu2 %v204_v49 }
  0xa7   :  { %867 = vmatpush.msra.mxu2 %v1303_v29 }
  0xa9   :  { %868 = vmatpush.msra.mxu2 %v1306_v31 }
  0xab   :  { %v1320_v47 = vpop.f32.mrf.mxu1  ;;  %869 = vmatpush.msra.mxu2 %v1309_v33 }
  0xad   :  { %870 = vmatpush.msra.mxu2 %v1312_v37 }
  0xaf   :  { %871 = vmatpush.msra.mxu2 %v1315_v41 }
  0xb1   :  { %872 = vmatpush.msra.mxu2 %v1318_v45 }
  0xb2   :  { %v1331_v61 = vpop.f32.mrf.mxu3 }
  0xb3   :  { %v407_v8 = vpop.f32.mrf.mxu1  ;;  %873 = vmatpush.msra.mxu2 %v1323_v50 }
  0xb5   :  { %874 = vmatpush.msra.mxu2 %v1326_v55 }
  0xb7   :  { %875 = vmatpush.msra.mxu2 %v1329_v59 }
  0xb9   :  { %876 = vmatpush.msra.mxu2 %v1334_v0 }
  0xba   :  { %v465_v28 = vpop.f32.mrf.mxu3 }
  0xbb   :  { %v410_v39 = vpop.f32.mrf.mxu1  ;;  %877 = vmatpush.msra.mxu2 %v1339_v1 }
  0xbd   :  { %878 = vmatpush.msra.mxu2 %v1342_v12 }
  0xbf   :  { %879 = vmatpush.msra.mxu2 %v1345_v17  ;;  %v738_v17 = vld [vmem:[#allocation7 + $0xf8] sm:$0xff] }
  0xc0   :  { %784 = vmatpush.msra.mxu3 %v738_v17  ;;  %v711_v17 = vld [vmem:[#allocation7 + $0x20] sm:$0xff] }
  0xc1   :  { %880 = vmatpush.msra.mxu2 %v1348_v22  ;;  %v721_v22 = vld [vmem:[#allocation7 + $0x70] sm:$0xff] }
  0xc2   :  { %v468_v54 = vpop.f32.mrf.mxu3 }
  0xc3   :  { %v413_v63 = vpop.f32.mrf.mxu1  ;;  %881 = vmatpush.msra.mxu2 %v1351_v30 }
  0xc5   :  { %882 = vmatpush.msra.mxu2 %v1353_v36 }
  0xca   :  { %v471_v14 = vpop.f32.mrf.mxu3 }
 0x109   :  { %v1336_v4 = vpop.f32.mrf.mxu0 }
 0x10a   :  { %v1362_v56 = vadd.f32 %v1320_v47, %v1336_v4 }
 0x10c   :  { %v494_v29 = vmul.f32 %v1362_v56, %v1362_v56 }
 0x10f   :  { %v433_v19 = vpop.f32.mrf.mxu2 }
 0x110   :  { %v1379_v31 = vadd.f32 %v1331_v61, %v433_v19 }
 0x111   :  { %v378_v27 = vpop.f32.mrf.mxu0 }
 0x112   :  { %v1357_v53 = vadd.f32 %v407_v8, %v378_v27  ;;  %v495_v10 = vmul.f32 %v1379_v31, %v1379_v31 }
 0x114   :  { %v496_v58 = vmul.f32 %v1357_v53, %v1357_v53  ;;  %v476_v47 = vadd.f32 %v1357_v53, %v1362_v56 }
 0x116   :  { %v502_v6 = vadd.f32 %v496_v58, %v494_v29 }
 0x117   :  { %v436_v46 = vpop.f32.mrf.mxu2 }
 0x118   :  { %v1369_v60 = vadd.f32 %v465_v28, %v436_v46 }
 0x119   :  { %v381_v52 = vpop.f32.mrf.mxu0 }
 0x11a   :  { %v1364_v57 = vadd.f32 %v410_v39, %v381_v52  ;;  %v497_v8 = vmul.f32 %v1369_v60, %v1369_v60  ;;  %v485_v16 = vadd.f32 %v1369_v60, %v1379_v31 }
 0x11c   :  { %v498_v2 = vmul.f32 %v1364_v57, %v1364_v57  ;;  %v477_v33 = vadd.f32 %v476_v47, %v1364_v57  ;;  %v511_v19 = vadd.f32 %v497_v8, %v495_v10  ;;  %v737_v47 = vld [vmem:[#allocation7 + $0xf0] sm:$0xff]  ;;  %v752_v10 = vld [vmem:[#allocation7 + $0x168] sm:$0xff] }
 0x11d   :  { %785 = vmatpush.msra.mxu3 %v737_v47  ;;  %v743_v47 = vld [vmem:[#allocation7 + $0x120] sm:$0xff] }
 0x11e   :  { %v503_v9 = vadd.f32 %v502_v6, %v498_v2  ;;  %v722_v2 = vld [vmem:[#allocation7 + $0x78] sm:$0xff]  ;;  %v736_v6 = vld [vmem:[#allocation7 + $0xe8] sm:$0xff] }
 0x11f   :  { %v439_v62 = vpop.f32.mrf.mxu2  ;;  %755 = vmatpush.msra.mxu1 %v722_v2  ;;  %786 = vmatpush.msra.mxu3 %v736_v6  ;;  %v710_v6 = vld [vmem:[#allocation7 + $0x18] sm:$0xff] }
 0x120   :  { %v1381_v4 = vadd.f32 %v468_v54, %v439_v62 }
 0x121   :  { %v384_v5 = vpop.f32.mrf.mxu0  ;;  %756 = vmatpush.msra.mxu1 %v721_v22  ;;  %v742_v22 = vld [vmem:[#allocation7 + $0x118] sm:$0xff] }
 0x122   :  { %v1385_v7 = vadd.f32 %v413_v63, %v384_v5  ;;  %v499_v37 = vmul.f32 %v1381_v4, %v1381_v4  ;;  %v486_v21 = vadd.f32 %v485_v16, %v1381_v4  ;;  %v754_v5 = vld [vmem:[#allocation7 + $0x178] sm:$0xff] }
 0x123   :  { %813 = vmatpush.msra.mxu0 %v754_v5  ;;  %v734_v16 = vld [vmem:[#allocation7 + $0xd8] sm:$0xff]  ;;  %v725_v5 = vld [vmem:[#allocation7 + $0x90] sm:$0xff] }
 0x124   :  { %v478_v11 = vadd.f32 %v477_v33, %v1385_v7  ;;  %v500_v61 = vmul.f32 %v1385_v7, %v1385_v7  ;;  %v512_v27 = vadd.f32 %v511_v19, %v499_v37  ;;  %v753_v33 = vld [vmem:[#allocation7 + $0x170] sm:$0xff] }
 0x125   :  { %814 = vmatpush.msra.mxu0 %v753_v33 }
 0x126   :  { %v479_v18 = vrot.slane %v478_v11, 4  ;;  %v504_v41 = vadd.f32 %v503_v9, %v500_v61  ;;  %v735_v9 = vld [vmem:[#allocation7 + $0xe0] sm:$0xff]  ;;  %v720_v61 = vld [vmem:[#allocation7 + $0x68] sm:$0xff] }
 0x127   :  { %v442_v20 = vpop.f32.mrf.mxu2  ;;  %787 = vmatpush.msra.mxu3 %v735_v9  ;;  %757 = vmatpush.msra.mxu1 %v720_v61  ;;  %v709_v9 = vld [vmem:[#allocation7 + $0x10] sm:$0xff]  ;;  %v723_v61 = vld [vmem:[#allocation7 + $0x80] sm:$0xff] }
 0x128   :  { %v480_v24 = vadd.f32 %v479_v18, %v478_v11  ;;  %v505_v25 = vrot.slane %v504_v41, 4  ;;  %v1402_v26 = vadd.f32 %v471_v14, %v442_v20  ;;  %815 = vmatpush.msra.mxu0 %v752_v10  ;;  %v719_v18 = vld [vmem:[#allocation7 + $0x60] sm:$0xff] }
 0x129   :  { %788 = vmatpush.msra.mxu3 %v734_v16  ;;  %758 = vmatpush.msra.mxu1 %v719_v18  ;;  %v740_v18 = vld [vmem:[#allocation7 + $0x108] sm:$0xff] }
 0x12a   :  { %v481_v28 = vrot.slane %v480_v24, 2  ;;  %v506_v45 = vadd.f32 %v505_v25, %v504_v41  ;;  %v487_v32 = vadd.f32 %v486_v21, %v1402_v26  ;;  %v501_v34 = vmul.f32 %v1402_v26, %v1402_v26  ;;  %v751_v41 = vld [vmem:[#allocation7 + $0x160] sm:$0xff]  ;;  %v733_v21 = vld [vmem:[#allocation7 + $0xd0] sm:$0xff]  ;;  %v750_v25 = vld [vmem:[#allocation7 + $0x158] sm:$0xff] }
 0x12b   :  { %816 = vmatpush.msra.mxu0 %v751_v41  ;;  %789 = vmatpush.msra.mxu3 %v733_v21  ;;  %v707_v21 = vld [vmem:[#allocation7] sm:$0xff] }
 0x12c   :  { %v488_v35 = vrot.slane %v487_v32, 4  ;;  %v513_v50 = vadd.f32 %v512_v27, %v501_v34  ;;  %v482_v38 = vadd.f32 %v481_v28, %v480_v24  ;;  %v507_v39 = vrot.slane %v506_v45, 2  ;;  %v718_v24 = vld [vmem:[#allocation7 + $0x58] sm:$0xff]  ;;  %v749_v34 = vld [vmem:[#allocation7 + $0x150] sm:$0xff] }
 0x12d   :  { %759 = vmatpush.msra.mxu1 %v718_v24  ;;  %817 = vmatpush.msra.mxu0 %v750_v25  ;;  %v739_v24 = vld [vmem:[#allocation7 + $0x100] sm:$0xff] }
 0x12e   :  { %v489_v40 = vadd.f32 %v488_v35, %v487_v32  ;;  %v514_v42 = vrot.slane %v513_v50, 4  ;;  %v483_v43 = vrot.slane %v482_v38, 1  ;;  %v508_v44 = vadd.f32 %v507_v39, %v506_v45  ;;  %v732_v45 = vld [vmem:[#allocation7 + $0xc8] sm:$0xff]  ;;  %v717_v32 = vld [vmem:[#allocation7 + $0x50] sm:$0xff] }
 0x12f   :  { %790 = vmatpush.msra.mxu3 %v732_v45  ;;  %760 = vmatpush.msra.mxu1 %v717_v32  ;;  %v716_v39 = vld [vmem:[#allocation7 + $0x48] sm:$0xff] }
 0x130   :  { %v490_v55 = vrot.slane %v489_v40, 2  ;;  %v515_v46 = vadd.f32 %v514_v42, %v513_v50  ;;  %v509_v48 = vrot.slane %v508_v44, 1  ;;  %v484_v49 = vadd.f32 %v483_v43, %v482_v38  ;;  %818 = vmatpush.msra.mxu0 %v749_v34  ;;  %v731_v38 = vld [vmem:[#allocation7 + $0xc0] sm:$0xff] }
 0x131   :  { %791 = vmatpush.msra.mxu3 %v731_v38  ;;  %761 = vmatpush.msra.mxu1 %v716_v39 }
 0x132   :  { %v510_v59 = vadd.f32 %v509_v48, %v508_v44  ;;  %v491_v52 = vadd.f32 %v490_v55, %v489_v40  ;;  %v516_v54 = vrot.slane %v515_v46, 2  ;;  %v748_v40 = vld [vmem:[#allocation7 + $0x148] sm:$0xff]  ;;  %v730_v44 = vld [vmem:[#allocation7 + $0xb8] sm:$0xff]  ;;  %v715_v55 = vld [vmem:[#allocation7 + $0x40] sm:$0xff] }
 0x133   :  { %819 = vmatpush.msra.mxu0 %v748_v40  ;;  %792 = vmatpush.msra.mxu3 %v730_v44 }
 0x134   :  { %v521_v0 = vsel %vm520_vm7, %v484_v49, %v510_v59  ;;  %v492_v58 = vrot.slane %v491_v52, 1  ;;  %v517_v62 = vadd.f32 %v516_v54, %v515_v46  ;;  %v747_v46 = vld [vmem:[#allocation7 + $0x140] sm:$0xff]  ;;  %762 = vmatpush.msra.mxu1 %v715_v55  ;;  %v729_v59 = vld [vmem:[#allocation7 + $0xb0] sm:$0xff]  ;;  %v746_v54 = vld [vmem:[#allocation7 + $0x138] sm:$0xff] }
 0x135   :  { %539 = vmatmul.f32.vlgmr.msrb.gmra.mxu1 %v521_v0  ;;  %579 = vmatmul.f32.vlgmr.msrb.gmra.mxu0 %v521_v0  ;;  %v728_v0 = vld [vmem:[#allocation7 + $0xa8] sm:$0xff] }
 0x136   :  { %v518_v63 = vrot.slane %v517_v62, 1  ;;  %v493_v1 = vadd.f32 %v492_v58, %v491_v52  ;;  %820 = vmatpush.msra.mxu0 %v747_v46  ;;  %793 = vmatpush.msra.mxu3 %v729_v59  ;;  %v714_v52 = vld [vmem:[#allocation7 + $0x38] sm:$0xff]  ;;  %v713_v58 = vld [vmem:[#allocation7 + $0x30] sm:$0xff] }
 0x137   :  { %763 = vmatpush.msra.mxu1 %v714_v52 }
 0x138   :  { %v519_v29 = vadd.f32 %v518_v63, %v517_v62  ;;  %821 = vmatpush.msra.mxu0 %v746_v54  ;;  %794 = vmatpush.msra.mxu3 %v728_v0  ;;  %v745_v62 = vld [vmem:[#allocation7 + $0x130] sm:$0xff]  ;;  %v727_v63 = vld [vmem:[#allocation7 + $0xa0] sm:$0xff] }
 0x139   :  { %764 = vmatpush.msra.mxu1 %v713_v58 }
 0x13a   :  { %v522_v12 = vsel %vm520_vm7, %v493_v1, %v519_v29  ;;  %822 = vmatpush.msra.mxu0 %v745_v62  ;;  %795 = vmatpush.msra.mxu3 %v727_v63  ;;  %v712_v1 = vld [vmem:[#allocation7 + $0x28] sm:$0xff] }
 0x13b   :  { %559 = vmatmul.f32.vlgmr.msrb.gmra.mxu3 %v522_v12  ;;  %599 = vmatmul.f32.vlgmr.msrb.gmra.mxu2 %v522_v12  ;;  %v744_v29 = vld [vmem:[#allocation7 + $0x128] sm:$0xff]  ;;  %v726_v12 = vld [vmem:[#allocation7 + $0x98] sm:$0xff] }
 0x13c   :  { %765 = vmatpush.msra.mxu1 %v712_v1  ;;  %823 = vmatpush.msra.mxu0 %v744_v29 }
 0x13d   :  { %796 = vmatpush.msra.mxu3 %v726_v12 }
 0x13e   :  { %766 = vmatpush.msra.mxu1 %v711_v17  ;;  %824 = vmatpush.msra.mxu0 %v743_v47 }
 0x13f   :  { %797 = vmatpush.msra.mxu3 %v725_v5 }
 0x140   :  { %767 = vmatpush.msra.mxu1 %v710_v6  ;;  %825 = vmatpush.msra.mxu0 %v742_v22 }
 0x142   :  { %768 = vmatpush.msra.mxu1 %v709_v9 }
 0x1b2   :  { %v540_v8 = vpop.f32.mrf.mxu1  ;;  %v580_v30 = vpop.f32.mrf.mxu0 }
 0x1be   :  { %v560_v36 = vpop.f32.mrf.mxu3  ;;  %v600_v11 = vpop.f32.mrf.mxu2 }
 0x1bf   :  { %v561_v37 = vadd.f32 %v560_v36, %v540_v8  ;;  %v601_v14 = vadd.f32 %v600_v11, %v580_v30  ;;  %v724_v30 = vld [vmem:[#allocation7 + $0x88] sm:$0xff]  ;;  %v741_v36 = vld [vmem:[#allocation7 + $0x110] sm:$0xff] }
 0x1c0   :  { %798 = vmatpush.msra.mxu3 %v724_v30  ;;  %826 = vmatpush.msra.mxu0 %v741_v36 }
 0x1c1   :  { %v1418_v19 = vmul.f32 0.001953125, %v561_v37  ;;  %v1420_v20 = vmul.f32 0.001953125, %v601_v14  ;;  %v708_v37 = vld [vmem:[#allocation7 + $0x8] sm:$0xff] }
 0x1c2   :  { %799 = vmatpush.msra.mxu3 %v723_v61  ;;  %769 = vmatpush.msra.mxu1 %v708_v37 }
 0x1c3   :  { %v605_v27 = vmul.f32 %v1418_v19, %v1418_v19  ;;  %v606_v28 = vmul.f32 %v1420_v20, %v1420_v20  ;;  %827 = vmatpush.msra.mxu0 %v740_v18 }
 0x1c4   :  { %770 = vmatpush.msra.mxu1 %v707_v21 }
 0x1c5   :  { %v609_v35 = vrot.slane %v605_v27, 7  ;;  %v610_v50 = vrot.slane %v606_v28, 7  ;;  %828 = vmatpush.msra.mxu0 %v739_v24 }
 0x1c7   :  { %v613_v42 = vsub.f32 %v1418_v19, %v609_v35  ;;  %v614_v43 = vsub.f32 %v1420_v20, %v610_v50  ;;  %v474_v35 = vld [vmem:[%s1504_s3] sm:$0x3] }
 0x1c9   :  { %v1428_v48 = vadd.f32 1e-05, %v613_v42  ;;  %v1430_v49 = vadd.f32 1e-05, %v614_v43  ;;  %v475_v43 = vld [vmem:[#allocation8] sm:$0x3] }
 0x1cb   :  { %982 = vrsqrt.f32 %v1428_v48  ;;  %vm623_vm10 = vweird.f32 %v1428_v48  ;;  %vm633_vm12 = vweird.f32 %v1430_v49 }
 0x1cc   :  { %984 = vrsqrt.f32 %v1430_v49 }
 0x1d1   :  { %v983_v2 = vpop.eup %982 }
 0x1d2   :  { %v985_v33 = vpop.eup %984  ;;  %v618_v8 = vmul.f32 %v983_v2, %v1428_v48  ;;  %vm624_vm8 = vweird.f32 %v983_v2 }
 0x1d3   :  { %v628_v11 = vmul.f32 %v985_v33, %v1430_v49  ;;  %vm634_vm9 = vweird.f32 %v985_v33  ;;  %vm625_vm11 = vmor %vm623_vm10, %vm624_vm8 }
 0x1d4   :  { %v619_v10 = vmul.f32 %v983_v2, %v618_v8  ;;  %vm635_vm13 = vmor %vm633_vm12, %vm634_vm9 }
 0x1d5   :  { %v629_v14 = vmul.f32 %v985_v33, %v628_v11 }
 0x1d6   :  { %v620_v16 = vmul.f32 0.5, %v619_v10 }
 0x1d7   :  { %v630_v41 = vmul.f32 0.5, %v629_v14 }
 0x1d8   :  { %v621_v25 = vsub.f32 1.5, %v620_v16 }
 0x1d9   :  { %v631_v27 = vsub.f32 1.5, %v630_v41 }
 0x1da   :  { %v622_v28 = vmul.f32 %v983_v2, %v621_v25 }
 0x1db   :  { %v632_v45 = vmul.f32 %v985_v33, %v631_v27 }
 0x1dc   :  { %v626_v32 = vsel %vm625_vm11, %v983_v2, %v622_v28 }
 0x1dd   :  { %639 = vst [vmem:[#allocation1] sm:$0xff] %v626_v32  ;;  %v636_v34 = vsel %vm635_vm13, %v985_v33, %v632_v45 }
 0x1de   :  { %640 = vst [vmem:[#allocation1 + $0x9] sm:$0xff] %v636_v34 }
 0x1e5   :  { %v642_v50 = vld [vmem:[#allocation1 + $0x1] ss:$9 sm:$0xff] }
 0x1e6   :  { %v644_v38 = vmul.f32 %v642_v50, %v474_v35 }
 0x1e8   :  { %v646_v39 = vperm.slane %v644_v38, 0  ;;  %v647_v40 = vperm.slane %v644_v38, 1 }
 0x1ea   :  { %v651_v42 = vmul.f32 %v647_v40, %v1420_v20  ;;  %v650_v44 = vmul.f32 %v646_v39, %v1418_v19  ;;  %v658_v49 = vmul.f32 %v646_v39, %v1362_v56  ;;  %v664_v54 = vmul.f32 %v646_v39, %v1385_v7 }
 0x1eb   :  { %v660_v0 = vmul.f32 %v646_v39, %v1357_v53  ;;  %v659_v58 = vmul.f32 %v647_v40, %v1379_v31  ;;  %v661_v62 = vmul.f32 %v647_v40, %v1369_v60  ;;  %v663_v20 = vmul.f32 %v647_v40, %v1381_v4 }
 0x1ec   :  { %v654_v55 = vrot.slane %v651_v42, 7  ;;  %v665_v19 = vmul.f32 %v647_v40, %v1402_v26  ;;  %v662_v12 = vmul.f32 %v646_v39, %v1364_v57 }
 0x1ee   :  { %v655_v46 = vsel %vm520_vm7, %v650_v44, %v654_v55 }
 0x1ef   :  { %v657_v48 = vsub.f32 %v475_v43, %v655_v46 }
 0x1f1   :  { %v667_v59 = vperm.slane %v657_v48, 0  ;;  %v668_v52 = vperm.slane %v657_v48, 1 }
 0x1f3   :  { %v671_v63 = vadd.f32 %v667_v59, %v658_v49  ;;  %v677_v1 = vadd.f32 %v667_v59, %v664_v54  ;;  %v673_v29 = vadd.f32 %v667_v59, %v660_v0  ;;  %v1452_v56 = vadd.f32 %v668_v52, %v659_v58 }
 0x1f4   :  { %v1454_v17 = vadd.f32 %v668_v52, %v661_v62  ;;  %v1456_v7 = vadd.f32 %v668_v52, %v663_v20  ;;  %v1458_v53 = vadd.f32 %v668_v52, %v665_v19  ;;  %v675_v2 = vadd.f32 %v667_v59, %v662_v12 }
 0x1f5   :  { %v679_v31 = vmax.f32 %v671_v63, 0.0  ;;  %v682_v47 = vmax.f32 %v677_v1, 0.0  ;;  %v680_v60 = vmax.f32 %v673_v29, 0.0 }
 0x1f6   :  { %v681_v33 = vmax.f32 %v675_v2, 0.0 }
 0x1f7   :  { %800 = vmatmul.f32.vlgmr.msra.gmra.mxu3 %v679_v31  ;;  %v683_v4 = vrot.slane %v679_v31, 7  ;;  %v686_v26 = vrot.slane %v682_v47, 7  ;;  %v695_v5 = vrot.slane %v679_v31, 1  ;;  %v696_v6 = vrot.slane %v680_v60, 1 }
 0x1f8   :  { %v684_v8 = vrot.slane %v680_v60, 7  ;;  %v697_v30 = vrot.slane %v681_v33, 1  ;;  %v685_v11 = vrot.slane %v681_v33, 7  ;;  %v698_v61 = vrot.slane %v682_v47, 1 }
 0x1f9   :  { %v690_v57 = vsel %vm239_vm0, %v686_v26, %v683_v4  ;;  %v701_v22 = vsel %vm260_vm2, %v695_v5, %v696_v6 }
 0x1fa   :  { %967 = vmatmul.msk.f32.vlgmr.msra.gmra.mxu1 %vm1284_vm5, %v690_v57  ;;  %829 = vmatmul.f32.vlgmr.msra.gmra.mxu0 %v701_v22  ;;  %v689_v9 = vsel %vm239_vm0, %v683_v4, %v684_v8  ;;  %v700_v36 = vsel %vm260_vm2, %v696_v6, %v697_v30  ;;  %v688_v15 = vsel %vm239_vm0, %v684_v8, %v685_v11 }
 0x1fb   :  { %v699_v10 = vsel %vm260_vm2, %v697_v30, %v698_v61  ;;  %v687_v37 = vsel %vm239_vm0, %v685_v11, %v686_v26  ;;  %v702_v3 = vsel %vm260_vm2, %v698_v61, %v695_v5 }
 0x1ff   :  { %803 = vmatmul.f32.gmra.mxu3 %v680_v60 }
 0x202   :  { %774 = vmatmul.f32.gmra.mxu1 %v689_v9  ;;  %969 = vmatmul.msk.f32.gmra.mxu0 %vm1255_vm3, %v700_v36 }
 0x207   :  { %806 = vmatmul.f32.gmra.mxu3 %v681_v33 }
 0x20a   :  { %968 = vmatmul.msk.f32.gmra.mxu1 %vm1295_vm6, %v688_v15  ;;  %835 = vmatmul.f32.gmra.mxu0 %v699_v10  ;;  %v842_v15 = vld [vmem:[%s1506_s5] sm:$0x1]  ;;  %s1150_s5 = smov [#allocation11]  }
 0x20f   :  { %809 = vmatmul.f32.gmra.mxu3 %v682_v47 }
 0x212   :  { %780 = vmatmul.f32.gmra.mxu1 %v687_v37  ;;  %970 = vmatmul.msk.f32.gmra.mxu0 %vm1276_vm4, %v702_v3  ;;  %v843_v3 = vld [vmem:[%s1507_s6] sm:$0x1]  ;;  %s942_s6 = sshll.u32 %s1150_s5, 4  ;;  %s943_s6 = int_to_ptr.vmem [resolvable:$true] %s942_s6 }
 0x277   :  { %v772_v14 = vpop.f32.mrf.mxu1  ;;  %v830_v16 = vpop.f32.mrf.mxu0 }
 0x27a   :  { %v801_v18 = vpop.f32.mrf.mxu3 }
 0x27b   :  { %v802_v45 = vadd.f32 %v801_v18, %v772_v14 }
 0x27d   :  { %v831_v35 = vadd.f32 %v830_v16, %v802_v45 }
 0x27f   :  { %v775_v41 = vpop.f32.mrf.mxu1  ;;  %v833_v21 = vpop.f32.mrf.mxu0  ;;  %v853_v13 = vmul.f32 %v831_v35, %v831_v35 }
 0x282   :  { %v804_v24 = vpop.f32.mrf.mxu3 }
 0x283   :  { %v805_v25 = vadd.f32 %v804_v24, %v775_v41 }
 0x285   :  { %v834_v34 = vadd.f32 %v833_v21, %v805_v25 }
 0x287   :  { %v778_v23 = vpop.f32.mrf.mxu1  ;;  %v836_v27 = vpop.f32.mrf.mxu0  ;;  %v854_v50 = vmul.f32 %v834_v34, %v834_v34  ;;  %v844_v40 = vadd.f32 %v834_v34, %v831_v35 }
 0x289   :  { %v857_v55 = vadd.f32 %v854_v50, %v853_v13 }
 0x28a   :  { %v807_v28 = vpop.f32.mrf.mxu3 }
 0x28b   :  { %v808_v32 = vadd.f32 %v807_v28, %v778_v23 }
 0x28d   :  { %v837_v51 = vadd.f32 %v836_v27, %v808_v32 }
 0x28f   :  { %v781_v38 = vpop.f32.mrf.mxu1  ;;  %v855_v42 = vmul.f32 %v837_v51, %v837_v51  ;;  %v839_v44 = vpop.f32.mrf.mxu0  ;;  %v845_v46 = vadd.f32 %v844_v40, %v837_v51 }
 0x291   :  { %v858_v49 = vadd.f32 %v857_v55, %v855_v42 }
 0x292   :  { %v810_v39 = vpop.f32.mrf.mxu3 }
 0x293   :  { %v811_v43 = vadd.f32 %v810_v39, %v781_v38 }
 0x295   :  { %v840_v48 = vadd.f32 %v839_v44, %v811_v43 }
 0x297   :  { %v846_v59 = vadd.f32 %v845_v46, %v840_v48  ;;  %v856_v52 = vmul.f32 %v840_v48, %v840_v48 }
 0x299   :  { %v847_v54 = vrot.slane %v846_v59, 4  ;;  %v859_v0 = vadd.f32 %v858_v49, %v856_v52 }
 0x29b   :  { %v848_v58 = vadd.f32 %v847_v54, %v846_v59  ;;  %v860_v62 = vrot.slane %v859_v0, 4 }
 0x29d   :  { %v849_v20 = vrot.slane %v848_v58, 2  ;;  %v861_v19 = vadd.f32 %v860_v62, %v859_v0 }
 0x29f   :  { %v850_v63 = vadd.f32 %v849_v20, %v848_v58  ;;  %v862_v1 = vrot.slane %v861_v19, 2 }
 0x2a1   :  { %v851_v29 = vrot.slane %v850_v63, 1  ;;  %v863_v12 = vadd.f32 %v862_v1, %v861_v19 }
 0x2a3   :  { %v864_v31 = vrot.slane %v863_v12, 1  ;;  %v852_v47 = vadd.f32 %v851_v29, %v850_v63 }
 0x2a5   :  { %v865_v60 = vadd.f32 %v864_v31, %v863_v12 }
 0x2a7   :  { %v866_v2 = vsel %vm520_vm7, %v852_v47, %v865_v60 }
 0x2a8   :  { %883 = vmatmul.f32.vlgmr.msra.gmra.mxu2 %v866_v2 }
 0x32b   :  { %v884_v4 = vpop.f32.mrf.mxu2 }
 0x32c   :  { %v887_v26 = vmul.f32 0.001953125, %v884_v4 }
 0x32e   :  { %v888_v5 = vmul.f32 %v887_v26, %v887_v26 }
 0x330   :  { %v890_v6 = vrot.slane %v888_v5, 7 }
 0x332   :  { %v892_v57 = vsub.f32 %v887_v26, %v890_v6 }
 0x334   :  { %v893_v22 = vadd.f32 1e-05, %v892_v57 }
 0x336   :  { %986 = vrsqrt.f32 %v893_v22  ;;  %vm900_vm15 = vweird.f32 %v893_v22 }
 0x33c   :  { %v987_v33 = vpop.eup %986 }
 0x33d   :  { %v895_v8 = vmul.f32 %v987_v33, %v893_v22  ;;  %vm901_vm14 = vweird.f32 %v987_v33 }
 0x33e   :  { %vm902_vm0 = vmor %vm900_vm15, %vm901_vm14 }
 0x33f   :  { %v896_v30 = vmul.f32 %v987_v33, %v895_v8 }
 0x341   :  { %v897_v9 = vmul.f32 0.5, %v896_v30 }
 0x343   :  { %v898_v36 = vsub.f32 1.5, %v897_v9 }
 0x345   :  { %v899_v11 = vmul.f32 %v987_v33, %v898_v36 }
 0x347   :  { %v903_v61 = vsel %vm902_vm0, %v987_v33, %v899_v11 }
 0x348   :  { %905 = vst [vmem:[#allocation1] sm:$0xff] %v903_v61 }
 0x34f   :  { %v907_v10 = vld [vmem:[#allocation1 + $0x1] ss:$9 sm:$0xff] }
 0x350   :  { %v909_v37 = vmul.f32 %v907_v10, %v842_v15 }
 0x352   :  { %v910_v14 = vmul.f32 %v909_v37, %v887_v26  ;;  %v913_v16 = vperm.slane %v909_v37, 0 }
 0x354   :  { %v911_v18 = vsub.f32 %v843_v3, %v910_v14  ;;  %v915_v41 = vmul.f32 %v913_v16, %v831_v35  ;;  %v916_v21 = vmul.f32 %v913_v16, %v834_v34  ;;  %v917_v24 = vmul.f32 %v913_v16, %v837_v51 }
 0x355   :  { %v918_v23 = vmul.f32 %v913_v16, %v840_v48 }
 0x356   :  { %v920_v25 = vperm.slane %v911_v18, 0 }
 0x358   :  { %v922_v27 = vadd.f32 %v920_v25, %v915_v41  ;;  %v923_v28 = vadd.f32 %v920_v25, %v916_v21  ;;  %v924_v45 = vadd.f32 %v920_v25, %v917_v24  ;;  %v925_v32 = vadd.f32 %v920_v25, %v918_v23 }
 0x35a   :  { %v926_v50 = vadd.f32 %v922_v27, %v1452_v56  ;;  %v927_v38 = vadd.f32 %v923_v28, %v1454_v17  ;;  %v928_v39 = vadd.f32 %v924_v45, %v1456_v7  ;;  %v929_v13 = vadd.f32 %v925_v32, %v1458_v53 }
 0x35c   :  { %v930_v40 = vmax.f32 %v926_v50, 0.0  ;;  %v931_v42 = vmax.f32 %v927_v38, 0.0  ;;  %v932_v43 = vmax.f32 %v928_v39, 0.0  ;;  %v933_v34 = vmax.f32 %v929_v13, 0.0 }
 0x35e   :  { %934 = vst [vmem:[#allocation11] sm:$0xff] %v930_v40 }
 0x35f   :  { %935 = vst [vmem:[#allocation11 + $0x8] sm:$0xff] %v931_v42 }
 0x360   :  { %936 = vst [vmem:[#allocation11 + $0x10] sm:$0xff] %v932_v43 }
 0x361   :  { %937 = vst [vmem:[#allocation11 + $0x18] sm:$0xff] %v933_v34 }
 0x362   :  { %950 = dma.vmem_to_hbm [thread:$0]  %s943_s6, 512, %s945_s15, [#allocation4], %s1145_s23, %s1145_s23, %s1146_s24  }
 0x363   :  { %1138 = dma.done.wait [#allocation4], 512  }
 0x364   :  { %1139 = vsyncadd [#allocation4], 4294966784 }
 0x365   :  { %955 = vsyncpa [#allocation3], 1 }
 0x366   :  { %956 = vsyncpa [#allocation6], 1 }
 0x367   :  { %957 = vsyncpa [#allocation9], 1 }
 0x368   :  { %958 = vsyncpa [#allocation4], 1 }

</bundles_post_ra>
